<compile_context>
chip_gen: v6e
topology: v6e:2x2x1
jax: 0.10.0
libtpu: 0.0.40
codegen_flags: <defaults>
</compile_context>

<pallas_src>
import math

import jax
import jax.numpy as jnp
from jax.experimental import pallas as pl
from jax.experimental.pallas import tpu as pltpu


def _round_up(x, m):
    return (x + m - 1) // m * m


def _pick_batch_block(B, n_query, graph_size, d_in, embed_pad, itemsize,
                      vmem_budget_bytes=24 * 1024 * 1024, target_rows=512):
    """Largest batch block that (a) gives the fused projections >= target_rows
    MXU rows, (b) keeps the double-buffered per-step q/h/out blocks inside a
    VMEM budget that fits every chip's default scoped VMEM (incl. v7x's 64 MiB
    physical / 32 MiB scoped), and (c) divides B (no ragged last step)."""
    bb = max(1, min(B, target_rows // max(n_query, 1)))
    if B >= 16:
        # Keep >= 8 grid steps so the 2 TensorCores (v7x) / double-buffering
        # still have steps to overlap.
        bb = min(bb, max(1, B // 8))

    def step_bytes(b):
        return 2 * itemsize * b * (n_query * d_in + graph_size * d_in
                                   + n_query * embed_pad)

    while bb > 1 and step_bytes(bb) > vmem_budget_bytes:
        bb -= 1
    while B % bb != 0:
        bb -= 1
    return bb


def _make_mha_kernel(n_heads, key_dim, val_dim, norm_factor, fuse_kv, mxu_dtype):
    H, kd, vd = n_heads, key_dim, val_dim
    cast = (lambda x: x.astype(mxu_dtype)) if mxu_dtype is not None else (lambda x: x)

    def _attend_and_project(Qc, Kc, Vc, wo, o_ref):
        # Qc: (BB, nq, H*kd)   Kc: (BB, g, H*kd)   Vc: (BB, g, H*vd)
        # wo: (H*vd, embed_pad)
        BB, nq, _ = Qc.shape
        e_pad = wo.shape[-1]
        out = jnp.zeros((BB * nq, e_pad), jnp.float32)
        # Per-head loop is statically unrolled (H is small).  The batch block
        # is handled by batched einsums -- no Python loop over batch.  Softmax
        # stays in f32 with an exact divide (the approximate EUP reciprocal
        # cost the previous rev its tolerance check).
        for hh in range(H):
            Qh = Qc[:, :, hh * kd:(hh + 1) * kd]
            Kh = Kc[:, :, hh * kd:(hh + 1) * kd]
            Vh = Vc[:, :, hh * vd:(hh + 1) * vd]
            s = norm_factor * jnp.einsum('bqd,bkd->bqk', cast(Qh), cast(Kh),
                                         preferred_element_type=jnp.float32)
            m = jnp.max(s, axis=-1, keepdims=True)
            e = jnp.exp(s - m)
            attn = e / jnp.sum(e, axis=-1, keepdims=True)
            ho = jnp.einsum('bqk,bkd->bqd', cast(attn), cast(Vh),
                            preferred_element_type=jnp.float32)
            # Accumulate the output projection head by head against a
            # sublane-aligned row slice of W_out (no H-way lane concatenate,
            # fewer live vregs).
            out = out + jnp.dot(cast(ho.reshape(BB * nq, vd)),
                                wo[hh * vd:(hh + 1) * vd, :],
                                preferred_element_type=jnp.float32)
        o_ref[...] = out.reshape(BB, nq, e_pad).astype(o_ref.dtype)

    if fuse_kv:
        def kernel(q_ref, h_ref, wq_ref, wkv_ref, wo_ref, o_ref):
            BB, nq, D = q_ref.shape
            _, g, _ = h_ref.shape
            # Flatten batch x seq so the fused projections feed the MXU with
            # BB*nq / BB*g rows instead of nq / g rows.
            qf = q_ref[...].reshape(BB * nq, D)
            hf = h_ref[...].reshape(BB * g, D)
            Qc = jnp.dot(qf, wq_ref[...], preferred_element_type=jnp.float32)
            KVc = jnp.dot(hf, wkv_ref[...], preferred_element_type=jnp.float32)
            Kc, Vc = KVc[:, :H * kd], KVc[:, H * kd:]   # 128-aligned split
            _attend_and_project(Qc.reshape(BB, nq, H * kd),
                                Kc.reshape(BB, g, H * kd),
                                Vc.reshape(BB, g, H * vd),
                                wo_ref[...], o_ref)
        return kernel

    def kernel(q_ref, h_ref, wq_ref, wk_ref, wv_ref, wo_ref, o_ref):
        BB, nq, D = q_ref.shape
        _, g, _ = h_ref.shape
        qf = q_ref[...].reshape(BB * nq, D)
        hf = h_ref[...].reshape(BB * g, D)
        Qc = jnp.dot(qf, wq_ref[...], preferred_element_type=jnp.float32)
        Kc = jnp.dot(hf, wk_ref[...], preferred_element_type=jnp.float32)
        Vc = jnp.dot(hf, wv_ref[...], preferred_element_type=jnp.float32)
        _attend_and_project(Qc.reshape(BB, nq, H * kd),
                            Kc.reshape(BB, g, H * kd),
                            Vc.reshape(BB, g, H * vd),
                            wo_ref[...], o_ref)
    return kernel


def multi_head_attention(q, h, W_query, W_key, W_val, W_out, *,
                         mxu_dtype=None, batch_block=None):
    """q: (B, n_query, D_in), h: (B, graph_size, D_in) or None (-> h = q).
    Returns (B, n_query, embed_dim).  mxu_dtype=jnp.bfloat16 feeds the MXU
    bf16 operands (v6e/v7x) while keeping softmax + accumulation in f32."""
    if h is None:
        h = q
    B, n_query, D_in = q.shape
    _, graph_size, _ = h.shape
    n_heads, _, key_dim = W_query.shape
    val_dim = W_val.shape[-1]
    embed_dim = W_out.shape[-1]
    norm_factor = 1.0 / math.sqrt(key_dim)
    out_dtype = q.dtype

    # Head-fused weight layouts, built once in the wrapper:
    #   (H, D_in, kd) -> (D_in, H*kd) head-major columns; W_out flattened to
    #   (H*vd, embed) then zero-padded to a 128 multiple so the output tile is
    #   lane-dense (unmasked vector stores).
    wq_cat = jnp.transpose(W_query, (1, 0, 2)).reshape(D_in, n_heads * key_dim)
    wk_cat = jnp.transpose(W_key, (1, 0, 2)).reshape(D_in, n_heads * key_dim)
    wv_cat = jnp.transpose(W_val, (1, 0, 2)).reshape(D_in, n_heads * val_dim)
    embed_pad = _round_up(embed_dim, 128)
    wo_cat = W_out.reshape(n_heads * val_dim, embed_dim)
    if embed_pad != embed_dim:
        wo_cat = jnp.pad(wo_cat, ((0, 0), (0, embed_pad - embed_dim)))

    if mxu_dtype is not None:
        q, h = q.astype(mxu_dtype), h.astype(mxu_dtype)
        wq_cat, wk_cat = wq_cat.astype(mxu_dtype), wk_cat.astype(mxu_dtype)
        wv_cat, wo_cat = wv_cat.astype(mxu_dtype), wo_cat.astype(mxu_dtype)

    # Fuse the K and V projection weights into one matmul when the Kc/Vc split
    # point is 128-lane aligned (fills the 256-wide MXU on v6e/v7x and drops
    # one weight DMA / VMEM buffer pair).
    fuse_kv = (n_heads * key_dim) % 128 == 0
    if fuse_kv:
        weight_args = (wq_cat, jnp.concatenate([wk_cat, wv_cat], axis=-1), wo_cat)
    else:
        weight_args = (wq_cat, wk_cat, wv_cat, wo_cat)

    itemsize = jnp.dtype(q.dtype).itemsize
    bb = batch_block or _pick_batch_block(B, n_query, graph_size, D_in,
                                          embed_pad, itemsize)
    assert B % bb == 0, "batch block must divide batch size"
    grid = (B // bb,)

    kernel = _make_mha_kernel(n_heads, key_dim, val_dim, norm_factor,
                              fuse_kv, mxu_dtype)

    # Weights: constant block index -> DMA'd once, VMEM-resident for the whole
    # grid.  (Single-buffering them via pipeline_mode would save a little more
    # VMEM; omitted here for portability.)
    weight_specs = [pl.BlockSpec(w.shape, lambda b: (0, 0)) for w in weight_args]
    in_specs = [
        pl.BlockSpec((bb, n_query, D_in), lambda b: (b, 0, 0)),
        pl.BlockSpec((bb, graph_size, D_in), lambda b: (b, 0, 0)),
        *weight_specs,
    ]

    flops = (2 * B * n_query * D_in * n_heads * key_dim
             + 2 * B * graph_size * D_in * n_heads * (key_dim + val_dim)
             + 2 * B * n_heads * n_query * graph_size * (key_dim + val_dim)
             + 2 * B * n_query * n_heads * val_dim * embed_pad)
    bytes_accessed = itemsize * (q.size + h.size + B * n_query * embed_pad
                                 + sum(w.size for w in weight_args))
    cost = pl.CostEstimate(flops=flops,
                           transcendentals=B * n_heads * n_query * graph_size,
                           bytes_accessed=bytes_accessed)

    out_padded = pl.pallas_call(
        kernel,
        out_shape=jax.ShapeDtypeStruct((B, n_query, embed_pad), out_dtype),
        grid_spec=pltpu.PrefetchScalarGridSpec(
            num_scalar_prefetch=0,
            grid=grid,
            in_specs=in_specs,
            out_specs=pl.BlockSpec((bb, n_query, embed_pad), lambda b: (b, 0, 0)),
        ),
        compiler_params=pltpu.CompilerParams(
            dimension_semantics=("parallel",),
            vmem_limit_bytes=32 * 1024 * 1024,
        ),
        cost_estimate=cost,
    )(q, h, *weight_args)

    if embed_pad != embed_dim:
        return out_padded[:, :, :embed_dim]
    return out_padded


def reference_mha(q, h, W_query, W_key, W_val, W_out, precision=None):
    """Pure-JAX reference matching the PyTorch forward exactly."""
    n_heads, input_dim, key_dim = W_query.shape
    val_dim = W_val.shape[-1]
    embed_dim = W_out.shape[-1]
    B, n_query, _ = q.shape
    _, graph_size, _ = h.shape
    norm = 1.0 / math.sqrt(key_dim)

    qflat = q.reshape(-1, input_dim)
    hflat = h.reshape(-1, input_dim)
    Q = jnp.matmul(qflat, W_query, precision=precision).reshape(
        n_heads, B, n_query, key_dim)
    K = jnp.matmul(hflat, W_key, precision=precision).reshape(
        n_heads, B, graph_size, key_dim)
    V = jnp.matmul(hflat, W_val, precision=precision).reshape(
        n_heads, B, graph_size, val_dim)
    compat = norm * jnp.matmul(Q, jnp.swapaxes(K, 2, 3), precision=precision)
    attn = jax.nn.softmax(compat, axis=-1)
    heads = jnp.matmul(attn, V, precision=precision)  # (H, B, n_query, vd)
    out = jnp.matmul(
        jnp.transpose(heads, (1, 2, 0, 3)).reshape(-1, n_heads * val_dim),
        W_out.reshape(-1, embed_dim),
        precision=precision,
    ).reshape(B, n_query, embed_dim)
    return out


def init_params(key, n_heads, input_dim, embed_dim, val_dim=None, key_dim=None):
    if val_dim is None:
        val_dim = embed_dim // n_heads
    if key_dim is None:
        key_dim = val_dim
    k1, k2, k3, k4 = jax.random.split(key, 4)

    def uni(k, shape):
        stdv = 1.0 / math.sqrt(shape[-1])
        return jax.random.uniform(k, shape, jnp.float32, minval=-stdv, maxval=stdv)

    W_query = uni(k1, (n_heads, input_dim, key_dim))
    W_key = uni(k2, (n_heads, input_dim, key_dim))
    W_val = uni(k3, (n_heads, input_dim, val_dim))
    W_out = uni(k4, (n_heads, val_dim, embed_dim))
    return W_query, W_key, W_val, W_out


def _check(out, ref_hi, ref_lo, atol, rtol, name):
    # XLA's default f32 matmul precision on TPU truncates operands to bf16,
    # while a compiled Mosaic kernel runs its f32 matmuls at full precision
    # (and an interpreted kernel inherits XLA's default).  Accept agreement
    # with either the HIGHEST-precision or the default-precision reference.
    ok_hi = bool(jnp.allclose(out, ref_hi, atol=atol, rtol=rtol))
    ok_lo = bool(jnp.allclose(out, ref_lo, atol=atol, rtol=rtol))
    assert ok_hi or ok_lo, f"{name}: kernel output mismatches both references"


if __name__ == "__main__":
    root = jax.random.PRNGKey(0)
    k1, k2, k3, k4, k5 = jax.random.split(root, 5)

    # --- Config 1: tiny self-attention (h is q), embed padded 32 -> 128,
    #     separate K/V projection weights, auto batch block. ---
    B, n_query, input_dim, n_heads, embed_dim = 2, 8, 32, 4, 32
    q1 = jax.random.normal(k1, (B, n_query, input_dim), jnp.float32)
    W1 = init_params(k2, n_heads, input_dim, embed_dim)

    out1 = jax.block_until_ready(multi_head_attention(q1, None, *W1))
    ref1_hi = reference_mha(q1, q1, *W1, precision=jax.lax.Precision.HIGHEST)
    ref1_lo = reference_mha(q1, q1, *W1)
    assert out1.shape == (B, n_query, embed_dim)
    _check(out1, ref1_hi, ref1_lo, 5e-3, 5e-3, "f32 self-attention")

    # --- Config 2: cross-attention at the module's usual dims (n_heads=8,
    #     embed=128) -> exercises the fused KV projection, the unpadded
    #     lane-dense output and a multi-step batch-blocked grid.  The small
    #     batch_block=2 is forced to get a 4-step grid at toy scale; the auto
    #     picker targets >=512 projection rows per step on real sizes. ---
    B2, nq2, g2, D2, H2, E2 = 8, 16, 16, 128, 8, 128
    q2 = jax.random.normal(k3, (B2, nq2, D2), jnp.float32)
    h2 = jax.random.normal(k4, (B2, g2, D2), jnp.float32)
    W2 = init_params(k5, H2, D2, E2)

    out2 = jax.block_until_ready(
        multi_head_attention(q2, h2, *W2, batch_block=2))
    ref2_hi = reference_mha(q2, h2, *W2, precision=jax.lax.Precision.HIGHEST)
    ref2_lo = reference_mha(q2, h2, *W2)
    assert out2.shape == (B2, nq2, E2)
    _check(out2, ref2_hi, ref2_lo, 5e-3, 5e-3, "f32 cross-attention")

    # --- bf16 MXU feed (v6e/v7x throughput path); softmax stays f32. ---
    out1_bf16 = jax.block_until_ready(
        multi_head_attention(q1, None, *W1, mxu_dtype=jnp.bfloat16))
    assert bool(jnp.allclose(out1_bf16, ref1_hi, atol=5e-2, rtol=5e-2)), \
        "bf16 MXU path diverged beyond bf16 tolerance"

    print("KERNEL_OK")
</pallas_src>

<mosaic_0001>
module attributes {stable_mosaic.version = 11 : i64} {
  func.func @kernel(%arg0: i32, %arg1: memref<2x8x32xf32, #tpu.memory_space<vmem>>, %arg2: memref<2x8x32xf32, #tpu.memory_space<vmem>>, %arg3: memref<32x32xf32, #tpu.memory_space<vmem>>, %arg4: memref<32x32xf32, #tpu.memory_space<vmem>>, %arg5: memref<32x32xf32, #tpu.memory_space<vmem>>, %arg6: memref<32x128xf32, #tpu.memory_space<vmem>>, %arg7: memref<2x8x128xf32, #tpu.memory_space<vmem>>) attributes {dimension_semantics = [#tpu.dimension_semantics<parallel>], iteration_bounds = array<i64: 1>, scalar_prefetch = 0 : i64, scratch_operands = 0 : i64, tpu.core_type = #tpu.core_type<tc>, window_params = [{transform_indices = @transform_0, window_bounds = array<i64: 2, 8, 32>}, {transform_indices = @transform_1, window_bounds = array<i64: 2, 8, 32>}, {pipeline_mode = #tpu.pipeline_mode<synchronous>, transform_indices = @transform_2, window_bounds = array<i64: 32, 32>}, {pipeline_mode = #tpu.pipeline_mode<synchronous>, transform_indices = @transform_3, window_bounds = array<i64: 32, 32>}, {pipeline_mode = #tpu.pipeline_mode<synchronous>, transform_indices = @transform_4, window_bounds = array<i64: 32, 32>}, {pipeline_mode = #tpu.pipeline_mode<synchronous>, transform_indices = @transform_5, window_bounds = array<i64: 32, 128>}, {transform_indices = @transform_6, window_bounds = array<i64: 2, 8, 128>}]} {
    %c0 = arith.constant 0 : index
    %c0_0 = arith.constant 0 : index
    %c0_1 = arith.constant 0 : index
    %0 = vector.load %arg1[%c0, %c0_0, %c0_1] : memref<2x8x32xf32, #tpu.memory_space<vmem>>, vector<2x8x32xf32>
    %1 = vector.shape_cast %0 : vector<2x8x32xf32> to vector<16x32xf32>
    %c0_2 = arith.constant 0 : index
    %c0_3 = arith.constant 0 : index
    %c0_4 = arith.constant 0 : index
    %2 = vector.load %arg2[%c0_2, %c0_3, %c0_4] : memref<2x8x32xf32, #tpu.memory_space<vmem>>, vector<2x8x32xf32>
    %3 = vector.shape_cast %2 : vector<2x8x32xf32> to vector<16x32xf32>
    %c0_5 = arith.constant 0 : index
    %c0_6 = arith.constant 0 : index
    %4 = vector.load %arg3[%c0_5, %c0_6] : memref<32x32xf32, #tpu.memory_space<vmem>>, vector<32x32xf32>
    %cst = arith.constant dense<0.000000e+00> : vector<16x32xf32>
    %5 = tpu.matmul %1, %4, %cst {dimension_numbers = #tpu.dot_dimension_numbers<[1], [0], [0], [1], [0, 0, 1, 1], [], []>} : vector<16x32xf32>, vector<32x32xf32>, vector<16x32xf32> -> vector<16x32xf32>
    %c0_7 = arith.constant 0 : index
    %c0_8 = arith.constant 0 : index
    %6 = vector.load %arg4[%c0_7, %c0_8] : memref<32x32xf32, #tpu.memory_space<vmem>>, vector<32x32xf32>
    %cst_9 = arith.constant dense<0.000000e+00> : vector<16x32xf32>
    %7 = tpu.matmul %3, %6, %cst_9 {dimension_numbers = #tpu.dot_dimension_numbers<[1], [0], [0], [1], [0, 0, 1, 1], [], []>} : vector<16x32xf32>, vector<32x32xf32>, vector<16x32xf32> -> vector<16x32xf32>
    %c0_10 = arith.constant 0 : index
    %c0_11 = arith.constant 0 : index
    %8 = vector.load %arg5[%c0_10, %c0_11] : memref<32x32xf32, #tpu.memory_space<vmem>>, vector<32x32xf32>
    %cst_12 = arith.constant dense<0.000000e+00> : vector<16x32xf32>
    %9 = tpu.matmul %3, %8, %cst_12 {dimension_numbers = #tpu.dot_dimension_numbers<[1], [0], [0], [1], [0, 0, 1, 1], [], []>} : vector<16x32xf32>, vector<32x32xf32>, vector<16x32xf32> -> vector<16x32xf32>
    %10 = vector.shape_cast %5 : vector<16x32xf32> to vector<2x8x32xf32>
    %11 = vector.shape_cast %7 : vector<16x32xf32> to vector<2x8x32xf32>
    %12 = vector.shape_cast %9 : vector<16x32xf32> to vector<2x8x32xf32>
    %c0_13 = arith.constant 0 : index
    %c0_14 = arith.constant 0 : index
    %13 = vector.load %arg6[%c0_13, %c0_14] : memref<32x128xf32, #tpu.memory_space<vmem>>, vector<32x128xf32>
    %cst_15 = arith.constant 0.000000e+00 : f32
    %14 = vector.broadcast %cst_15 : f32 to vector<16x128xf32>
    %15 = vector.extract_strided_slice %10 {offsets = [0, 0, 0], sizes = [2, 8, 8], strides = [1, 1, 1]} : vector<2x8x32xf32> to vector<2x8x8xf32>
    %16 = vector.extract_strided_slice %11 {offsets = [0, 0, 0], sizes = [2, 8, 8], strides = [1, 1, 1]} : vector<2x8x32xf32> to vector<2x8x8xf32>
    %17 = vector.extract_strided_slice %12 {offsets = [0, 0, 0], sizes = [2, 8, 8], strides = [1, 1, 1]} : vector<2x8x32xf32> to vector<2x8x8xf32>
    "tpu.trace_start"() <{level = 10 : i32, message = "bqd,bkd->bqk"}> : () -> ()
    %cst_16 = arith.constant dense<0.000000e+00> : vector<2x8x8xf32>
    %18 = tpu.matmul %15, %16, %cst_16 {dimension_numbers = #tpu.dot_dimension_numbers<[2], [2], [1], [1], [0, 0, 0, 1, 1, 1], [0], [0]>} : vector<2x8x8xf32>, vector<2x8x8xf32>, vector<2x8x8xf32> -> vector<2x8x8xf32>
    "tpu.trace_stop"() : () -> ()
    %cst_17 = arith.constant 0.353553385 : f32
    %19 = vector.broadcast %cst_17 : f32 to vector<2x8x8xf32>
    %20 = arith.mulf %19, %18 : vector<2x8x8xf32>
    %cst_18 = arith.constant dense<0xFF800000> : vector<2x8xf32>
    %21 = vector.multi_reduction <maximumf>, %20, %cst_18 [2] : vector<2x8x8xf32> to vector<2x8xf32>
    %22 = vector.shape_cast %21 : vector<2x8xf32> to vector<2x8x1xf32>
    %23 = vector.broadcast %22 : vector<2x8x1xf32> to vector<2x8x8xf32>
    %24 = arith.subf %20, %23 : vector<2x8x8xf32>
    %25 = math.exp %24 : vector<2x8x8xf32>
    %cst_19 = arith.constant dense<0.000000e+00> : vector<2x8xf32>
    %26 = vector.multi_reduction <add>, %25, %cst_19 [2] : vector<2x8x8xf32> to vector<2x8xf32>
    %27 = vector.shape_cast %26 : vector<2x8xf32> to vector<2x8x1xf32>
    %28 = vector.broadcast %27 : vector<2x8x1xf32> to vector<2x8x8xf32>
    %29 = arith.divf %25, %28 : vector<2x8x8xf32>
    "tpu.trace_start"() <{level = 10 : i32, message = "bqk,bkd->bqd"}> : () -> ()
    %cst_20 = arith.constant dense<0.000000e+00> : vector<2x8x8xf32>
    %30 = tpu.matmul %29, %17, %cst_20 {dimension_numbers = #tpu.dot_dimension_numbers<[2], [1], [1], [2], [0, 0, 0, 1, 1, 2], [0], [0]>} : vector<2x8x8xf32>, vector<2x8x8xf32>, vector<2x8x8xf32> -> vector<2x8x8xf32>
    "tpu.trace_stop"() : () -> ()
    %31 = vector.shape_cast %30 : vector<2x8x8xf32> to vector<16x8xf32>
    %32 = vector.extract_strided_slice %13 {offsets = [0, 0], sizes = [8, 128], strides = [1, 1]} : vector<32x128xf32> to vector<8x128xf32>
    %cst_21 = arith.constant dense<0.000000e+00> : vector<16x128xf32>
    %33 = tpu.matmul %31, %32, %cst_21 {dimension_numbers = #tpu.dot_dimension_numbers<[1], [0], [0], [1], [0, 0, 1, 1], [], []>} : vector<16x8xf32>, vector<8x128xf32>, vector<16x128xf32> -> vector<16x128xf32>
    %34 = arith.addf %14, %33 : vector<16x128xf32>
    %35 = vector.extract_strided_slice %10 {offsets = [0, 0, 8], sizes = [2, 8, 8], strides = [1, 1, 1]} : vector<2x8x32xf32> to vector<2x8x8xf32>
    %36 = vector.extract_strided_slice %11 {offsets = [0, 0, 8], sizes = [2, 8, 8], strides = [1, 1, 1]} : vector<2x8x32xf32> to vector<2x8x8xf32>
    %37 = vector.extract_strided_slice %12 {offsets = [0, 0, 8], sizes = [2, 8, 8], strides = [1, 1, 1]} : vector<2x8x32xf32> to vector<2x8x8xf32>
    "tpu.trace_start"() <{level = 10 : i32, message = "bqd,bkd->bqk"}> : () -> ()
    %cst_22 = arith.constant dense<0.000000e+00> : vector<2x8x8xf32>
    %38 = tpu.matmul %35, %36, %cst_22 {dimension_numbers = #tpu.dot_dimension_numbers<[2], [2], [1], [1], [0, 0, 0, 1, 1, 1], [0], [0]>} : vector<2x8x8xf32>, vector<2x8x8xf32>, vector<2x8x8xf32> -> vector<2x8x8xf32>
    "tpu.trace_stop"() : () -> ()
    %cst_23 = arith.constant 0.353553385 : f32
    %39 = vector.broadcast %cst_23 : f32 to vector<2x8x8xf32>
    %40 = arith.mulf %39, %38 : vector<2x8x8xf32>
    %cst_24 = arith.constant dense<0xFF800000> : vector<2x8xf32>
    %41 = vector.multi_reduction <maximumf>, %40, %cst_24 [2] : vector<2x8x8xf32> to vector<2x8xf32>
    %42 = vector.shape_cast %41 : vector<2x8xf32> to vector<2x8x1xf32>
    %43 = vector.broadcast %42 : vector<2x8x1xf32> to vector<2x8x8xf32>
    %44 = arith.subf %40, %43 : vector<2x8x8xf32>
    %45 = math.exp %44 : vector<2x8x8xf32>
    %cst_25 = arith.constant dense<0.000000e+00> : vector<2x8xf32>
    %46 = vector.multi_reduction <add>, %45, %cst_25 [2] : vector<2x8x8xf32> to vector<2x8xf32>
    %47 = vector.shape_cast %46 : vector<2x8xf32> to vector<2x8x1xf32>
    %48 = vector.broadcast %47 : vector<2x8x1xf32> to vector<2x8x8xf32>
    %49 = arith.divf %45, %48 : vector<2x8x8xf32>
    "tpu.trace_start"() <{level = 10 : i32, message = "bqk,bkd->bqd"}> : () -> ()
    %cst_26 = arith.constant dense<0.000000e+00> : vector<2x8x8xf32>
    %50 = tpu.matmul %49, %37, %cst_26 {dimension_numbers = #tpu.dot_dimension_numbers<[2], [1], [1], [2], [0, 0, 0, 1, 1, 2], [0], [0]>} : vector<2x8x8xf32>, vector<2x8x8xf32>, vector<2x8x8xf32> -> vector<2x8x8xf32>
    "tpu.trace_stop"() : () -> ()
    %51 = vector.shape_cast %50 : vector<2x8x8xf32> to vector<16x8xf32>
    %52 = vector.extract_strided_slice %13 {offsets = [8, 0], sizes = [8, 128], strides = [1, 1]} : vector<32x128xf32> to vector<8x128xf32>
    %cst_27 = arith.constant dense<0.000000e+00> : vector<16x128xf32>
    %53 = tpu.matmul %51, %52, %cst_27 {dimension_numbers = #tpu.dot_dimension_numbers<[1], [0], [0], [1], [0, 0, 1, 1], [], []>} : vector<16x8xf32>, vector<8x128xf32>, vector<16x128xf32> -> vector<16x128xf32>
    %54 = arith.addf %34, %53 : vector<16x128xf32>
    %55 = vector.extract_strided_slice %10 {offsets = [0, 0, 16], sizes = [2, 8, 8], strides = [1, 1, 1]} : vector<2x8x32xf32> to vector<2x8x8xf32>
    %56 = vector.extract_strided_slice %11 {offsets = [0, 0, 16], sizes = [2, 8, 8], strides = [1, 1, 1]} : vector<2x8x32xf32> to vector<2x8x8xf32>
    %57 = vector.extract_strided_slice %12 {offsets = [0, 0, 16], sizes = [2, 8, 8], strides = [1, 1, 1]} : vector<2x8x32xf32> to vector<2x8x8xf32>
    "tpu.trace_start"() <{level = 10 : i32, message = "bqd,bkd->bqk"}> : () -> ()
    %cst_28 = arith.constant dense<0.000000e+00> : vector<2x8x8xf32>
    %58 = tpu.matmul %55, %56, %cst_28 {dimension_numbers = #tpu.dot_dimension_numbers<[2], [2], [1], [1], [0, 0, 0, 1, 1, 1], [0], [0]>} : vector<2x8x8xf32>, vector<2x8x8xf32>, vector<2x8x8xf32> -> vector<2x8x8xf32>
    "tpu.trace_stop"() : () -> ()
    %cst_29 = arith.constant 0.353553385 : f32
    %59 = vector.broadcast %cst_29 : f32 to vector<2x8x8xf32>
    %60 = arith.mulf %59, %58 : vector<2x8x8xf32>
    %cst_30 = arith.constant dense<0xFF800000> : vector<2x8xf32>
    %61 = vector.multi_reduction <maximumf>, %60, %cst_30 [2] : vector<2x8x8xf32> to vector<2x8xf32>
    %62 = vector.shape_cast %61 : vector<2x8xf32> to vector<2x8x1xf32>
    %63 = vector.broadcast %62 : vector<2x8x1xf32> to vector<2x8x8xf32>
    %64 = arith.subf %60, %63 : vector<2x8x8xf32>
    %65 = math.exp %64 : vector<2x8x8xf32>
    %cst_31 = arith.constant dense<0.000000e+00> : vector<2x8xf32>
    %66 = vector.multi_reduction <add>, %65, %cst_31 [2] : vector<2x8x8xf32> to vector<2x8xf32>
    %67 = vector.shape_cast %66 : vector<2x8xf32> to vector<2x8x1xf32>
    %68 = vector.broadcast %67 : vector<2x8x1xf32> to vector<2x8x8xf32>
    %69 = arith.divf %65, %68 : vector<2x8x8xf32>
    "tpu.trace_start"() <{level = 10 : i32, message = "bqk,bkd->bqd"}> : () -> ()
    %cst_32 = arith.constant dense<0.000000e+00> : vector<2x8x8xf32>
    %70 = tpu.matmul %69, %57, %cst_32 {dimension_numbers = #tpu.dot_dimension_numbers<[2], [1], [1], [2], [0, 0, 0, 1, 1, 2], [0], [0]>} : vector<2x8x8xf32>, vector<2x8x8xf32>, vector<2x8x8xf32> -> vector<2x8x8xf32>
    "tpu.trace_stop"() : () -> ()
    %71 = vector.shape_cast %70 : vector<2x8x8xf32> to vector<16x8xf32>
    %72 = vector.extract_strided_slice %13 {offsets = [16, 0], sizes = [8, 128], strides = [1, 1]} : vector<32x128xf32> to vector<8x128xf32>
    %cst_33 = arith.constant dense<0.000000e+00> : vector<16x128xf32>
    %73 = tpu.matmul %71, %72, %cst_33 {dimension_numbers = #tpu.dot_dimension_numbers<[1], [0], [0], [1], [0, 0, 1, 1], [], []>} : vector<16x8xf32>, vector<8x128xf32>, vector<16x128xf32> -> vector<16x128xf32>
    %74 = arith.addf %54, %73 : vector<16x128xf32>
    %75 = vector.extract_strided_slice %10 {offsets = [0, 0, 24], sizes = [2, 8, 8], strides = [1, 1, 1]} : vector<2x8x32xf32> to vector<2x8x8xf32>
    %76 = vector.extract_strided_slice %11 {offsets = [0, 0, 24], sizes = [2, 8, 8], strides = [1, 1, 1]} : vector<2x8x32xf32> to vector<2x8x8xf32>
    %77 = vector.extract_strided_slice %12 {offsets = [0, 0, 24], sizes = [2, 8, 8], strides = [1, 1, 1]} : vector<2x8x32xf32> to vector<2x8x8xf32>
    "tpu.trace_start"() <{level = 10 : i32, message = "bqd,bkd->bqk"}> : () -> ()
    %cst_34 = arith.constant dense<0.000000e+00> : vector<2x8x8xf32>
    %78 = tpu.matmul %75, %76, %cst_34 {dimension_numbers = #tpu.dot_dimension_numbers<[2], [2], [1], [1], [0, 0, 0, 1, 1, 1], [0], [0]>} : vector<2x8x8xf32>, vector<2x8x8xf32>, vector<2x8x8xf32> -> vector<2x8x8xf32>
    "tpu.trace_stop"() : () -> ()
    %cst_35 = arith.constant 0.353553385 : f32
    %79 = vector.broadcast %cst_35 : f32 to vector<2x8x8xf32>
    %80 = arith.mulf %79, %78 : vector<2x8x8xf32>
    %cst_36 = arith.constant dense<0xFF800000> : vector<2x8xf32>
    %81 = vector.multi_reduction <maximumf>, %80, %cst_36 [2] : vector<2x8x8xf32> to vector<2x8xf32>
    %82 = vector.shape_cast %81 : vector<2x8xf32> to vector<2x8x1xf32>
    %83 = vector.broadcast %82 : vector<2x8x1xf32> to vector<2x8x8xf32>
    %84 = arith.subf %80, %83 : vector<2x8x8xf32>
    %85 = math.exp %84 : vector<2x8x8xf32>
    %cst_37 = arith.constant dense<0.000000e+00> : vector<2x8xf32>
    %86 = vector.multi_reduction <add>, %85, %cst_37 [2] : vector<2x8x8xf32> to vector<2x8xf32>
    %87 = vector.shape_cast %86 : vector<2x8xf32> to vector<2x8x1xf32>
    %88 = vector.broadcast %87 : vector<2x8x1xf32> to vector<2x8x8xf32>
    %89 = arith.divf %85, %88 : vector<2x8x8xf32>
    "tpu.trace_start"() <{level = 10 : i32, message = "bqk,bkd->bqd"}> : () -> ()
    %cst_38 = arith.constant dense<0.000000e+00> : vector<2x8x8xf32>
    %90 = tpu.matmul %89, %77, %cst_38 {dimension_numbers = #tpu.dot_dimension_numbers<[2], [1], [1], [2], [0, 0, 0, 1, 1, 2], [0], [0]>} : vector<2x8x8xf32>, vector<2x8x8xf32>, vector<2x8x8xf32> -> vector<2x8x8xf32>
    "tpu.trace_stop"() : () -> ()
    %91 = vector.shape_cast %90 : vector<2x8x8xf32> to vector<16x8xf32>
    %92 = vector.extract_strided_slice %13 {offsets = [24, 0], sizes = [8, 128], strides = [1, 1]} : vector<32x128xf32> to vector<8x128xf32>
    %cst_39 = arith.constant dense<0.000000e+00> : vector<16x128xf32>
    %93 = tpu.matmul %91, %92, %cst_39 {dimension_numbers = #tpu.dot_dimension_numbers<[1], [0], [0], [1], [0, 0, 1, 1], [], []>} : vector<16x8xf32>, vector<8x128xf32>, vector<16x128xf32> -> vector<16x128xf32>
    %94 = arith.addf %74, %93 : vector<16x128xf32>
    %95 = vector.shape_cast %94 : vector<16x128xf32> to vector<2x8x128xf32>
    %c0_40 = arith.constant 0 : index
    %c0_41 = arith.constant 0 : index
    %c0_42 = arith.constant 0 : index
    %96 = vector.load %arg7[%c0_40, %c0_41, %c0_42] : memref<2x8x128xf32, #tpu.memory_space<vmem>>, vector<2x8x128xf32>
    tpu.vector_store %arg7[%c0_40, %c0_41, %c0_42], %95 {strides = array<i32>} : memref<2x8x128xf32, #tpu.memory_space<vmem>>, vector<2x8x128xf32>,
    return
  }
  func.func @transform_0(%arg0: i32) -> (i32, i32, i32) {
    %c0_i32 = arith.constant 0 : i32
    %c0_i32_0 = arith.constant 0 : i32
    %c0_i32_1 = arith.constant 0 : i32
    return %arg0, %c0_i32, %c0_i32_0 : i32, i32, i32
  }
  func.func @transform_1(%arg0: i32) -> (i32, i32, i32) {
    %c0_i32 = arith.constant 0 : i32
    %c0_i32_0 = arith.constant 0 : i32
    %c0_i32_1 = arith.constant 0 : i32
    return %arg0, %c0_i32, %c0_i32_0 : i32, i32, i32
  }
  func.func @transform_2(%arg0: i32) -> (i32, i32) {
    %c0_i32 = arith.constant 0 : i32
    %c0_i32_0 = arith.constant 0 : i32
    %c0_i32_1 = arith.constant 0 : i32
    return %c0_i32, %c0_i32_0 : i32, i32
  }
  func.func @transform_3(%arg0: i32) -> (i32, i32) {
    %c0_i32 = arith.constant 0 : i32
    %c0_i32_0 = arith.constant 0 : i32
    %c0_i32_1 = arith.constant 0 : i32
    return %c0_i32, %c0_i32_0 : i32, i32
  }
  func.func @transform_4(%arg0: i32) -> (i32, i32) {
    %c0_i32 = arith.constant 0 : i32
    %c0_i32_0 = arith.constant 0 : i32
    %c0_i32_1 = arith.constant 0 : i32
    return %c0_i32, %c0_i32_0 : i32, i32
  }
  func.func @transform_5(%arg0: i32) -> (i32, i32) {
    %c0_i32 = arith.constant 0 : i32
    %c0_i32_0 = arith.constant 0 : i32
    %c0_i32_1 = arith.constant 0 : i32
    return %c0_i32, %c0_i32_0 : i32, i32
  }
  func.func @transform_6(%arg0: i32) -> (i32, i32, i32) {
    %c0_i32 = arith.constant 0 : i32
    %c0_i32_0 = arith.constant 0 : i32
    %c0_i32_1 = arith.constant 0 : i32
    return %arg0, %c0_i32, %c0_i32_0 : i32, i32, i32
  }
}

</mosaic_0001>

<bundles_post_ra>
// kernel: tpu_custom_call.1
= control target key start
LH: loop header
LB: loop body
LE: loop exit
PB: predicated region body
PF: predicated region fallthrough
CT: control target
= control target key end

     0   :  { %11 = vsyncpa [#allocation3], 0  ;;  %s2723_s0 = inlined_call_operand.hbm [shape: f32[2,8,32], index: 0, kind: input, shape index: {}]   ;;  %s2724_s1 = inlined_call_operand.hbm [shape: f32[2,8,32], index: 1, kind: input, shape index: {}]   ;;  %s2725_s2 = inlined_call_operand.hbm [shape: f32[32,32], index: 2, kind: input, shape index: {}]   ;;  %s2726_s3 = inlined_call_operand.hbm [shape: f32[32,32], index: 3, kind: input, shape index: {}]   ;;  %s2727_s4 = inlined_call_operand.hbm [shape: f32[32,32], index: 4, kind: input, shape index: {}]   ;;  %s2728_s5 = inlined_call_operand.hbm [shape: f32[32,128], index: 5, kind: input, shape index: {}]   ;;  %s2729_s6 = inlined_call_operand.hbm [shape: f32[2,8,128], index: 6, kind: output, shape index: {}]  }
   0x1   :  { %12 = vsyncpa [#allocation6], 0 }
   0x2   :  { %13 = vsyncpa [#allocation9], 0 }
   0x3   :  { %14 = vsyncpa [#allocation12], 0 }
   0x4   :  { %15 = vsyncpa [#allocation4], 0  ;;  %s2464_s21 = smov [#allocation5]   ;;  %s2465_s23 = smov [#allocation8]  }
   0x5   :  { %s33_s22 = sshll.u32 %s2464_s21, 4  ;;  %s57_s24 = sshll.u32 %s2465_s23, 4  ;;  %s34_s22 = int_to_ptr.vmem [resolvable:$true] %s33_s22  ;;  %s58_s24 = int_to_ptr.vmem [resolvable:$true] %s57_s24 }
   0x6   :  { %s2322_s25 = scalar_lea.vmem %s34_s22, 256  ;;  %p2327_p1 = scmp.lt.s32.totalorder %s34_s22, %s34_s22 }
   0x7   :  { %p2323_p0 = scmp.ne.s32.totalorder %s34_s22, %s2322_s25  ;;  %p2328_p2 = scmp.lt.s32.totalorder %s2322_s25, %s2322_s25 }
   0x9   :  { %p2329_p3 = por %p2328_p2, %p2327_p1 }
   0xb   :  { %p2330_p4 = pnand %p2329_p3, %p2323_p0 }
   0xd   :  { %2333 = shalt.err (!%p2330_p4)
}
   0xe   :  { %s2466_s26 = smov 128   ;;  %s2467_s27 = smov 8  }
   0xf   :  { %39 = dma.hbm_to_vmem [thread:$0]  %s2724_s1, 256, %s34_s22, [#allocation6], %s2466_s26, %s2466_s26, %s2467_s27  }
  0x10   :  { %s2342_s30 = scalar_lea.vmem %s58_s24, 512  ;;  %p2347_p6 = scmp.lt.s32.totalorder %s58_s24, %s58_s24 }
  0x11   :  { %p2343_p5 = scmp.ne.s32.totalorder %s58_s24, %s2342_s30  ;;  %p2348_p7 = scmp.lt.s32.totalorder %s2342_s30, %s2342_s30 }
  0x13   :  { %p2349_p8 = por %p2348_p7, %p2347_p6 }
  0x15   :  { %p2350_p9 = pnand %p2349_p8, %p2343_p5 }
  0x17   :  { %2353 = shalt.err (!%p2350_p9)
}
  0x18   :  { %63 = dma.hbm_to_vmem [thread:$0]  %s2726_s3, 512, %s58_s24, [#allocation9], %s2466_s26, %s2466_s26, %s2467_s27  }
  0x19   :  { %s2468_s9 = smov [#allocation2]   ;;  %s2469_s11 = smov [#allocation7]  }
  0x1a   :  { %s21_s10 = sshll.u32 %s2468_s9, 4  ;;  %s45_s12 = sshll.u32 %s2469_s11, 4  ;;  %s22_s10 = int_to_ptr.vmem [resolvable:$true] %s21_s10  ;;  %s46_s12 = int_to_ptr.vmem [resolvable:$true] %s45_s12 }
  0x1b   :  { %s2362_s1 = scalar_lea.vmem %s22_s10, 256  ;;  %p2367_p11 = scmp.lt.s32.totalorder %s22_s10, %s22_s10 }
  0x1c   :  { %p2363_p10 = scmp.ne.s32.totalorder %s22_s10, %s2362_s1  ;;  %p2368_p12 = scmp.lt.s32.totalorder %s2362_s1, %s2362_s1 }
  0x1e   :  { %p2369_p13 = por %p2368_p12, %p2367_p11 }
  0x20   :  { %p2370_p0 = pnand %p2369_p13, %p2363_p10 }
  0x22   :  { %2373 = shalt.err (!%p2370_p0)
}
  0x23   :  { %27 = dma.hbm_to_vmem [thread:$0]  %s2723_s0, 256, %s22_s10, [#allocation3], %s2466_s26, %s2466_s26, %s2467_s27  }
  0x24   :  { %s2382_s3 = scalar_lea.vmem %s46_s12, 512  ;;  %p2387_p2 = scmp.lt.s32.totalorder %s46_s12, %s46_s12 }
  0x25   :  { %p2383_p1 = scmp.ne.s32.totalorder %s46_s12, %s2382_s3  ;;  %p2388_p3 = scmp.lt.s32.totalorder %s2382_s3, %s2382_s3 }
  0x27   :  { %p2389_p4 = por %p2388_p3, %p2387_p2 }
  0x29   :  { %p2390_p5 = pnand %p2389_p4, %p2383_p1 }
  0x2b   :  { %2393 = shalt.err (!%p2390_p5)
}
  0x2c   :  { %51 = dma.hbm_to_vmem [thread:$0]  %s2725_s2, 512, %s46_s12, [#allocation6], %s2466_s26, %s2466_s26, %s2467_s27  }
  0x2d   :  { %s2470_s17 = smov [#allocation10]   ;;  %s2471_s19 = smov [#allocation11]  }
  0x2e   :  { %s69_s18 = sshll.u32 %s2470_s17, 4  ;;  %s81_s20 = sshll.u32 %s2471_s19, 4  ;;  %s70_s18 = int_to_ptr.vmem [resolvable:$true] %s69_s18  ;;  %s82_s20 = int_to_ptr.vmem [resolvable:$true] %s81_s20 }
  0x2f   :  { %s2402_s0 = scalar_lea.vmem %s70_s18, 512  ;;  %p2407_p7 = scmp.lt.s32.totalorder %s70_s18, %s70_s18 }
  0x30   :  { %p2403_p6 = scmp.ne.s32.totalorder %s70_s18, %s2402_s0  ;;  %p2408_p8 = scmp.lt.s32.totalorder %s2402_s0, %s2402_s0 }
  0x32   :  { %p2409_p9 = por %p2408_p8, %p2407_p7 }
  0x34   :  { %p2410_p10 = pnand %p2409_p9, %p2403_p6 }
  0x36   :  { %2413 = shalt.err (!%p2410_p10)
}
  0x37   :  { %75 = dma.hbm_to_vmem [thread:$0]  %s2727_s4, 512, %s70_s18, [#allocation9], %s2466_s26, %s2466_s26, %s2467_s27  }
  0x38   :  { %s2422_s2 = scalar_lea.vmem %s82_s20, 512  ;;  %p2427_p12 = scmp.lt.s32.totalorder %s82_s20, %s82_s20 }
  0x39   :  { %p2423_p11 = scmp.ne.s32.totalorder %s82_s20, %s2422_s2  ;;  %p2428_p13 = scmp.lt.s32.totalorder %s2422_s2, %s2422_s2 }
  0x3b   :  { %p2429_p0 = por %p2428_p13, %p2427_p12 }
  0x3d   :  { %p2430_p1 = pnand %p2429_p0, %p2423_p11 }
  0x3f   :  { %2433 = shalt.err (!%p2430_p1)
}
  0x40   :  { %87 = dma.hbm_to_vmem [thread:$0]  %s2728_s5, 512, %s82_s20, [#allocation12], %s2466_s26, %s2466_s26, %s2467_s27  }
  0x41   :  { %2454 = dma.done.wait [#allocation3], 256  }
  0x42   :  { %2455 = vsyncadd [#allocation3], 4294967040 }
  0x43   :  { %2456 = dma.done.wait [#allocation6], 768  }
  0x44   :  { %2457 = vsyncadd [#allocation6], 4294966528 }
  0x45   :  { %2458 = dma.done.wait [#allocation9], 1024  }
  0x46   :  { %2459 = vsyncadd [#allocation9], 4294966272 }
  0x47   :  { %2460 = dma.done.wait [#allocation12], 512  }
  0x48   :  { %2461 = vsyncadd [#allocation12], 4294966784  ;;  %v199_v0 = vld [vmem:[#allocation8 + $0x18] sm:$0xff]  ;;  %v198_v2 = vld [vmem:[#allocation8 + $0x10] sm:$0xff]  ;;  %vm114_vm0 = vcmask 261120   ;;  %v2472_v12 = vmov 0.0  }
  0x49   :  { %v113_v1 = vld [vmem:[#allocation7 + $0x18] sm:$0xff]  ;;  %2146 = vmatprep.subr.mxu1 %v199_v0  ;;  %v112_v3 = vld [vmem:[#allocation7 + $0x10] sm:$0xff]  ;;  %v197_v4 = vld [vmem:[#allocation8 + $0x8] sm:$0xff]  ;;  %vm2473_vm1 = vmmov 0   ;;  %vm364_vm2 = vcmask 64512   ;;  %s2474_s4 = smov 120  }
  0x4a   :  { %2135 = vmatprep.subr.mxu0 %v113_v1  ;;  %2147 = vmatpush3.msra.mxu1 %v199_v0  ;;  %v111_v5 = vld [vmem:[#allocation7 + $0x8] sm:$0xff]  ;;  %v196_v6 = vld [vmem:[#allocation8] sm:$0xff]  ;;  %v108_v7 = vld [vmem:[#allocation5] sm:$0xff]  ;;  %s2475_s5 = smov 112   ;;  %s2476_s25 = smov 104  }
  0x4b   :  { %2136 = vmatpush3.msra.mxu0 %v113_v1  ;;  %2148 = vmatprep.subr.mxu1 %v198_v2  ;;  %v110_v8 = vld [vmem:[#allocation7] sm:$0xff]  ;;  %v109_v9 = vld [vmem:[#allocation5 + $0x8] sm:$0xff]  ;;  %v107_v11 = vld [vmem:[#allocation2 + $0x8] sm:$0xff]  ;;  %s2477_s28 = smov [#allocation13]  }
  0x4c   :  { %2137 = vmatprep.subr.mxu0 %v112_v3  ;;  %2149 = vmatpush3.msra.mxu1 %v198_v2  ;;  %v106_v10 = vld [vmem:[#allocation2] sm:$0xff]  ;;  %v284_v17 = vld [vmem:[#allocation10 + $0x18] sm:$0xff]  ;;  %v283_v18 = vld [vmem:[#allocation10 + $0x10] sm:$0xff]  ;;  %s2020_s29 = sshll.u32 %s2477_s28, 4  ;;  %s2021_s29 = int_to_ptr.vmem [resolvable:$true] %s2020_s29 }
  0x4d   :  { %2138 = vmatpush3.msra.mxu0 %v112_v3  ;;  %2150 = vmatprep.subr.mxu1 %v197_v4  ;;  %v282_v19 = vld [vmem:[#allocation10 + $0x8] sm:$0xff]  ;;  %v281_v20 = vld [vmem:[#allocation10] sm:$0xff]  ;;  %s2434_s30 = scalar_lea.vmem %s2021_s29, 256  ;;  %p2439_p3 = scmp.lt.s32.totalorder %s2021_s29, %s2021_s29 }
  0x4e   :  { %2139 = vmatprep.subr.mxu0 %v111_v5  ;;  %2151 = vmatpush3.msra.mxu1 %v197_v4  ;;  %p2435_p2 = scmp.ne.s32.totalorder %s2021_s29, %s2434_s30  ;;  %p2440_p4 = scmp.lt.s32.totalorder %s2434_s30, %s2434_s30 }
  0x4f   :  { %2140 = vmatpush3.msra.mxu0 %v111_v5  ;;  %2152 = vmatprep.subr.mxu1 %v196_v6 }
  0x50   :  { %2154 = vmatprep.mubr.msk.f32.mxu1 %vm114_vm0, %v108_v7  ;;  %2153 = vmatpush3.msra.mxu1 %v196_v6  ;;  %p2441_p5 = por %p2440_p4, %p2439_p3 }
  0x51   :  { %2141 = vmatprep.subr.mxu0 %v110_v8  ;;  %2155 = vmatmul.mubr.msk.f32.vlgmr.msra.gmra.mxu1 %vm114_vm0, %v109_v9 }
  0x52   :  { %2142 = vmatpush3.msra.mxu0 %v110_v8  ;;  %2143 = vmatprep.mubr.msk.f32.mxu0 %vm114_vm0, %v106_v10  ;;  %v360_v10 = vld [vmem:[#allocation11] sm:$0xff]  ;;  %p2442_p6 = pnand %p2441_p5, %p2435_p2 }
  0x53   :  { %2144 = vmatmul.mubr.msk.f32.vlgmr.msra.gmra.mxu0 %vm114_vm0, %v107_v11  ;;  %2168 = vmatprep.subr.mxu1 %v2472_v12 }
  0x54   :  { %2165 = vmatprep.mubr.msk.f32.mxu0 %vm114_vm0, %v108_v7  ;;  %2170 = vmatprep.mubr.msk.f32.mxu1 %vm2473_vm1, %v2472_v12 }
  0x55   :  { %2157 = vmatprep.subr.mxu0 %v284_v17 }
  0x56   :  { %2158 = vmatpush3.msra.mxu0 %v284_v17 }
  0x57   :  { %2159 = vmatprep.subr.mxu0 %v283_v18 }
  0x58   :  { %2160 = vmatpush3.msra.mxu0 %v283_v18 }
  0x59   :  { %2161 = vmatprep.subr.mxu0 %v282_v19 }
  0x5a   :  { %2162 = vmatpush3.msra.mxu0 %v282_v19 }
  0x5b   :  { %2163 = vmatprep.subr.mxu0 %v281_v20 }
  0x5c   :  { %2164 = vmatpush3.msra.mxu0 %v281_v20 }
  0x5d   :  { %2166 = vmatmul.mubr.msk.f32.vlgmr.msra.gmra.mxu0 %vm114_vm0, %v109_v9  ;;  %2178 = vmatprep.subr.mxu0 %v2472_v12 }
  0x5e   :  { %2180 = vmatprep.mubr.msk.f32.mxu0 %vm2473_vm1, %v2472_v12 }
 0x111   :  { %v2557_v13 = vpop.f32.mrf.mxu1 }
 0x112   :  { %767 = vrot.lane.b32.xlu1 %v2557_v13, %s2474_s4 }
 0x113   :  { %v2561_v14 = vpop.f32.mrf.mxu0  ;;  %v2563_v15 = vpop.f32.mrf.mxu1 }
 0x114   :  { %2169 = vmatpush3.xpose.msk.msra.mxu1 %vm364_vm2, %v2563_v15 }
 0x115   :  { %v2567_v16 = vpop.f32.mrf.mxu0  ;;  %2173 = vmatprep.subr.mxu1 %v2472_v12 }
 0x116   :  { %687 = vrot.lane.b32.xlu1 %v2567_v16, %s2474_s4 }
 0x117   :  { %2171 = vmatmul.mubr.msk.f32.vlgmr.msra.gmra.mxu1 %vm364_vm2, %v2567_v16 }
 0x118   :  { %2174 = vmatpush3.xpose.msk.msra.mxu1 %vm364_vm2, %v2557_v13  ;;  %2175 = vmatprep.mubr.msk.f32.mxu1 %vm2473_vm1, %v2472_v12 }
 0x119   :  { %2183 = vmatprep.subr.mxu1 %v2472_v12 }
 0x11b   :  { %2176 = vmatmul.mubr.msk.f32.vlgmr.msra.gmra.mxu1 %vm364_vm2, %v2561_v14 }
 0x11c   :  { %2185 = vmatprep.mubr.msk.f32.mxu1 %vm2473_vm1, %v2472_v12 }
 0x11d   :  { %v2593_v39 = vpop.f32.mrf.mxu0 }
 0x11e   :  { %2184 = vmatpush3.msra.mxu1 %v2593_v39 }
 0x11f   :  { %v2596_v40 = vpop.f32.mrf.mxu0  ;;  %2193 = vmatprep.subr.mxu1 %v2472_v12 }
 0x120   :  { %2179 = vmatpush3.msra.mxu0 %v2596_v40 }
 0x121   :  { %2188 = vmatprep.subr.mxu0 %v2472_v12 }
 0x184   :  { %v768_v41 = vpop.permute.xlu1 %767 }
 0x188   :  { %v688_v42 = vpop.permute.xlu1 %687 }
 0x1d7   :  { %v437_v21 = vpop.f32.mrf.mxu1 }
 0x1d8   :  { %v517_v22 = vmul.f32 0.35355338, %v437_v21 }
 0x1d9   :  { %v2172_v23 = vpop.f32.mrf.mxu1 }
 0x1da   :  { %v519_v24 = vsel %vm364_vm2, %v517_v22, -inf }
 0x1db   :  { %520 = vmax.xlane.f32.xlu0 %v519_v24  ;;  %v513_v25 = vpop.f32.mrf.mxu1 }
 0x1dc   :  { %v518_v26 = vmul.f32 0.35355338, %v513_v25 }
 0x1dd   :  { %v2177_v27 = vpop.f32.mrf.mxu1 }
 0x1de   :  { %v522_v28 = vsel %vm364_vm2, %v518_v26, -inf }
 0x1df   :  { %523 = vmax.xlane.f32.xlu0 %v522_v28 }
 0x1f5   :  { %689 = vrot.lane.b32.xlu0 %v2563_v15, %s2474_s4 }
 0x264   :  { %v521_v29 = vpop.xlane.xlu0 %520 }
 0x265   :  { %v525_v30 = vsub.f32 %v517_v22, %v521_v29 }
 0x267   :  { %v527_v31 = vmul.f32 1.442695, %v525_v30 }
 0x268   :  { %v524_v32 = vpop.xlane.xlu0 %523 }
 0x269   :  { %2282 = vpow2.f32 %v527_v31  ;;  %v526_v33 = vsub.f32 %v518_v26, %v524_v32  ;;  %v361_v26 = vld [vmem:[#allocation11 + $0x8] sm:$0xff] }
 0x26b   :  { %v529_v34 = vmul.f32 1.442695, %v526_v33 }
 0x26c   :  { %v690_v47 = vpop.permute.xlu0 %689 }
 0x26d   :  { %2284 = vpow2.f32 %v529_v34 }
 0x276   :  { %v2283_v35 = vpop.eup %2282 }
 0x277   :  { %v531_v36 = vsel %vm364_vm2, %v2283_v35, 0.0 }
 0x278   :  { %532 = vadd.xlane.f32.xlu1 %v531_v36 }
 0x27a   :  { %v2285_v37 = vpop.eup %2284 }
 0x27b   :  { %v534_v38 = vsel %vm364_vm2, %v2285_v37, 0.0 }
 0x27c   :  { %535 = vadd.xlane.f32.xlu1 %v534_v38 }
 0x28d   :  { %765 = vrot.lane.b32.xlu1 %v2561_v14, %s2474_s4 }
 0x301   :  { %v533_v43 = vpop.xlane.xlu1 %532 }
 0x302   :  { %2286 = vrcp.f32 %v533_v43 }
 0x305   :  { %v536_v44 = vpop.xlane.xlu1 %535 }
 0x306   :  { %2288 = vrcp.f32 %v536_v44 }
 0x309   :  { %v766_v50 = vpop.permute.xlu1 %765 }
 0x30f   :  { %v2287_v45 = vpop.eup %2286 }
 0x310   :  { %v538_v46 = vmul.f32 %v2287_v45, %v2283_v35 }
 0x312   :  { %2181 = vmatmul.mubr.msk.f32.vlgmr.msra.gmra.mxu0 %vm364_vm2, %v538_v46 }
 0x313   :  { %v2289_v48 = vpop.eup %2288  ;;  %2189 = vmatpush3.xpose.msk.msra.mxu0 %vm364_vm2, %v690_v47  ;;  %2190 = vmatprep.mubr.msk.f32.mxu0 %vm2473_vm1, %v2472_v12 }
 0x314   :  { %v540_v49 = vmul.f32 %v2289_v48, %v2285_v37  ;;  %2198 = vmatprep.subr.mxu0 %v2472_v12 }
 0x316   :  { %2186 = vmatmul.mubr.msk.f32.vlgmr.msra.gmra.mxu1 %vm364_vm2, %v540_v49  ;;  %2191 = vmatmul.mubr.msk.f32.vlgmr.msra.gmra.mxu0 %vm364_vm2, %v688_v42 }
 0x317   :  { %2194 = vmatpush3.xpose.msk.msra.mxu1 %vm364_vm2, %v768_v41  ;;  %2195 = vmatprep.mubr.msk.f32.mxu1 %vm2473_vm1, %v2472_v12 }
 0x318   :  { %2203 = vmatprep.subr.mxu1 %v2472_v12  ;;  %2200 = vmatprep.mubr.msk.f32.mxu0 %vm2473_vm1, %v2472_v12 }
 0x31a   :  { %2196 = vmatmul.mubr.msk.f32.vlgmr.msra.gmra.mxu1 %vm364_vm2, %v766_v50 }
 0x31b   :  { %2205 = vmatprep.mubr.msk.f32.mxu1 %vm2473_vm1, %v2472_v12 }
 0x3d2   :  { %v610_v51 = vpop.f32.mrf.mxu0 }
 0x3d4   :  { %v2182_v52 = vpop.f32.mrf.mxu0 }
 0x3d6   :  { %v683_v53 = vpop.f32.mrf.mxu1  ;;  %v761_v54 = vpop.f32.mrf.mxu0 }
 0x3d7   :  { %v843_v55 = vmul.f32 0.35355338, %v761_v54 }
 0x3d8   :  { %v2187_v56 = vpop.f32.mrf.mxu1  ;;  %v2192_v57 = vpop.f32.mrf.mxu0 }
 0x3d9   :  { %v845_v58 = vsel %vm364_vm2, %v843_v55, -inf }
 0x3da   :  { %v839_v59 = vpop.f32.mrf.mxu1  ;;  %846 = vmax.xlane.f32.xlu0 %v845_v58 }
 0x3db   :  { %v844_v60 = vmul.f32 0.35355338, %v839_v59 }
 0x3dc   :  { %v2197_v61 = vpop.f32.mrf.mxu1 }
 0x3dd   :  { %v848_v62 = vsel %vm364_vm2, %v844_v60, -inf }
 0x3de   :  { %849 = vmax.xlane.f32.xlu1 %v848_v62 }
 0x3ef   :  { %945 = vrot.lane.b32.xlu1 %v2593_v39, %s2474_s4 }
 0x3f3   :  { %1185 = vrot.lane.b32.xlu1 %v2563_v15, %s2475_s5 }
 0x3f7   :  { %1263 = vrot.lane.b32.xlu1 %v2557_v13, %s2475_s5 }
 0x3fb   :  { %1261 = vrot.lane.b32.xlu1 %v2561_v14, %s2475_s5 }
 0x463   :  { %v847_v63 = vpop.xlane.xlu0 %846 }
 0x464   :  { %v851_v0 = vsub.f32 %v843_v55, %v847_v63 }
 0x466   :  { %v853_v1 = vmul.f32 1.442695, %v851_v0 }
 0x467   :  { %v850_v2 = vpop.xlane.xlu1 %849 }
 0x468   :  { %2290 = vpow2.f32 %v853_v1  ;;  %v852_v3 = vsub.f32 %v844_v60, %v850_v2  ;;  %v362_v1 = vld [vmem:[#allocation11 + $0x10] sm:$0xff] }
 0x46a   :  { %v855_v4 = vmul.f32 1.442695, %v852_v3 }
 0x46b   :  { %v946_v5 = vpop.permute.xlu1 %945 }
 0x46c   :  { %2292 = vpow2.f32 %v855_v4  ;;  %2204 = vmatpush3.msra.mxu1 %v946_v5 }
 0x46d   :  { %2213 = vmatprep.subr.mxu1 %v360_v10 }
 0x46f   :  { %v1186_v21 = vpop.permute.xlu1 %1185 }
 0x473   :  { %v1264_v24 = vpop.permute.xlu1 %1263 }
 0x475   :  { %v2291_v6 = vpop.eup %2290 }
 0x476   :  { %v857_v7 = vsel %vm364_vm2, %v2291_v6, 0.0 }
 0x477   :  { %858 = vadd.xlane.f32.xlu0 %v857_v7  ;;  %v1262_v25 = vpop.permute.xlu1 %1261 }
 0x479   :  { %v2293_v8 = vpop.eup %2292 }
 0x47a   :  { %v860_v9 = vsel %vm364_vm2, %v2293_v8, 0.0 }
 0x47b   :  { %861 = vadd.xlane.f32.xlu0 %v860_v9 }
 0x491   :  { %868 = vrot.lane.b32.xlu0 %v2596_v40, %s2474_s4 }
 0x495   :  { %1183 = vrot.lane.b32.xlu0 %v2567_v16, %s2475_s5 }
 0x500   :  { %v859_v11 = vpop.xlane.xlu0 %858 }
 0x501   :  { %2294 = vrcp.f32 %v859_v11 }
 0x504   :  { %v862_v17 = vpop.xlane.xlu0 %861 }
 0x505   :  { %2296 = vrcp.f32 %v862_v17 }
 0x508   :  { %v869_v18 = vpop.permute.xlu0 %868 }
 0x509   :  { %2199 = vmatpush3.msra.mxu0 %v869_v18 }
 0x50a   :  { %2208 = vmatprep.subr.mxu0 %v361_v26 }
 0x50c   :  { %v1184_v31 = vpop.permute.xlu0 %1183 }
 0x50e   :  { %v2295_v19 = vpop.eup %2294 }
 0x50f   :  { %v864_v20 = vmul.f32 %v2295_v19, %v2291_v6 }
 0x511   :  { %2201 = vmatmul.mubr.msk.f32.vlgmr.msra.gmra.mxu0 %vm364_vm2, %v864_v20 }
 0x512   :  { %v2297_v22 = vpop.eup %2296  ;;  %2209 = vmatpush3.msra.mxu0 %v361_v26 }
 0x513   :  { %v866_v23 = vmul.f32 %v2297_v22, %v2293_v8  ;;  %2218 = vmatprep.subr.mxu0 %v2472_v12 }
 0x515   :  { %2206 = vmatmul.mubr.msk.f32.vlgmr.msra.gmra.mxu1 %vm364_vm2, %v866_v23 }
 0x516   :  { %2215 = vmatprep.mubr.msk.f32.mxu1 %vm364_vm2, %v610_v51  ;;  %2214 = vmatpush3.msra.mxu1 %v360_v10 }
 0x517   :  { %2223 = vmatprep.subr.mxu1 %v2472_v12 }
 0x519   :  { %2216 = vmatmul.mubr.msk.f32.vlgmr.msra.gmra.mxu1 %vm364_vm2, %v683_v53 }
 0x51a   :  { %2224 = vmatpush3.xpose.msk.msra.mxu1 %vm364_vm2, %v1264_v24  ;;  %2225 = vmatprep.mubr.msk.f32.mxu1 %vm2473_vm1, %v2472_v12 }
 0x51b   :  { %2233 = vmatprep.subr.mxu1 %v2472_v12 }
 0x51d   :  { %2226 = vmatmul.mubr.msk.f32.vlgmr.msra.gmra.mxu1 %vm364_vm2, %v1262_v25 }
 0x51e   :  { %2235 = vmatprep.mubr.msk.f32.mxu1 %vm2473_vm1, %v2472_v12 }
 0x5d1   :  { %v940_v27 = vpop.f32.mrf.mxu0 }
 0x5d2   :  { %2210 = vmatprep.mubr.msk.f32.mxu0 %vm364_vm2, %v940_v27 }
 0x5d3   :  { %v2202_v28 = vpop.f32.mrf.mxu0 }
 0x5d5   :  { %v1017_v29 = vpop.f32.mrf.mxu1 }
 0x5d6   :  { %2211 = vmatmul.mubr.msk.f32.vlgmr.msra.gmra.mxu0 %vm364_vm2, %v1017_v29 }
 0x5d7   :  { %2219 = vmatpush3.xpose.msk.msra.mxu0 %vm364_vm2, %v1186_v21  ;;  %v2207_v30 = vpop.f32.mrf.mxu1  ;;  %2220 = vmatprep.mubr.msk.f32.mxu0 %vm2473_vm1, %v2472_v12 }
 0x5d8   :  { %2228 = vmatprep.subr.mxu0 %v2472_v12 }
 0x5d9   :  { %v2654_v32 = vpop.f32.mrf.mxu1 }
 0x5da   :  { %2221 = vmatmul.mubr.msk.f32.vlgmr.msra.gmra.mxu0 %vm364_vm2, %v1184_v31 }
 0x5db   :  { %v2657_v33 = vpop.f32.mrf.mxu1  ;;  %2230 = vmatprep.mubr.msk.f32.mxu0 %vm2473_vm1, %v2472_v12 }
 0x5dd   :  { %v1335_v34 = vpop.f32.mrf.mxu1 }
 0x5de   :  { %v1340_v35 = vmul.f32 0.35355338, %v1335_v34 }
 0x5df   :  { %v2227_v36 = vpop.f32.mrf.mxu1 }
 0x5e0   :  { %v1344_v37 = vsel %vm364_vm2, %v1340_v35, -inf }
 0x5e1   :  { %1345 = vmax.xlane.f32.xlu1 %v1344_v37 }
 0x5f2   :  { %1439 = vrot.lane.b32.xlu1 %v2593_v39, %s2475_s5 }
 0x5f6   :  { %1600 = vrot.lane.b32.xlu1 %v2563_v15, %s2476_s25 }
 0x5fa   :  { %1678 = vrot.lane.b32.xlu1 %v2557_v13, %s2476_s25 }
 0x5fe   :  { %1676 = vrot.lane.b32.xlu1 %v2561_v14, %s2476_s25 }
 0x66a   :  { %v1346_v38 = vpop.xlane.xlu1 %1345 }
 0x66b   :  { %v1348_v42 = vsub.f32 %v1340_v35, %v1346_v38 }
 0x66d   :  { %v1351_v43 = vmul.f32 1.442695, %v1348_v42  ;;  %v363_v42 = vld [vmem:[#allocation11 + $0x18] sm:$0xff] }
 0x66e   :  { %v1440_v41 = vpop.permute.xlu1 %1439 }
 0x66f   :  { %2234 = vmatpush3.msra.mxu1 %v1440_v41  ;;  %2298 = vpow2.f32 %v1351_v43 }
 0x670   :  { %2243 = vmatprep.subr.mxu1 %v2472_v12 }
 0x672   :  { %v1601_v57 = vpop.permute.xlu1 %1600 }
 0x676   :  { %v1679_v5 = vpop.permute.xlu1 %1678 }
 0x67a   :  { %v1677_v8 = vpop.permute.xlu1 %1676 }
 0x67c   :  { %v2299_v48 = vpop.eup %2298 }
 0x67d   :  { %v1356_v14 = vsel %vm364_vm2, %v2299_v48, 0.0 }
 0x696   :  { %v2671_v44 = vpop.f32.mrf.mxu0 }
 0x697   :  { %v1180_v19 = vadd.f32 %v2654_v32, %v2671_v44 }
 0x698   :  { %v2673_v45 = vpop.f32.mrf.mxu0 }
 0x699   :  { %v1175_v21 = vadd.f32 %v2657_v33, %v2673_v45 }
 0x69a   :  { %v1257_v46 = vpop.f32.mrf.mxu0 }
 0x69b   :  { %v1339_v15 = vmul.f32 0.35355338, %v1257_v46 }
 0x69c   :  { %v2222_v47 = vpop.f32.mrf.mxu0 }
 0x69d   :  { %v1341_v13 = vsel %vm364_vm2, %v1339_v15, -inf }
 0x69e   :  { %1342 = vmax.xlane.f32.xlu0 %v1341_v13 }
 0x6a2   :  { %1357 = vadd.xlane.f32.xlu0 %v1356_v14 }
 0x727   :  { %v1343_v49 = vpop.xlane.xlu0 %1342 }
 0x728   :  { %v1347_v50 = vsub.f32 %v1339_v15, %v1343_v49 }
 0x72a   :  { %v1349_v51 = vmul.f32 1.442695, %v1347_v50 }
 0x72b   :  { %v1358_v52 = vpop.xlane.xlu0 %1357 }
 0x72c   :  { %2300 = vpow2.f32 %v1349_v51 }
 0x72d   :  { %2302 = vrcp.f32 %v1358_v52 }
 0x739   :  { %v2301_v53 = vpop.eup %2300 }
 0x73a   :  { %v2303_v54 = vpop.eup %2302  ;;  %v1353_v55 = vsel %vm364_vm2, %v2301_v53, 0.0 }
 0x73b   :  { %1354 = vadd.xlane.f32.xlu0 %v1353_v55  ;;  %v1362_v56 = vmul.f32 %v2303_v54, %v2299_v48 }
 0x73d   :  { %2236 = vmatmul.mubr.msk.f32.vlgmr.msra.gmra.mxu1 %vm364_vm2, %v1362_v56 }
 0x73e   :  { %2244 = vmatpush3.xpose.msk.msra.mxu1 %vm364_vm2, %v1601_v57  ;;  %2245 = vmatprep.mubr.msk.f32.mxu1 %vm2473_vm1, %v2472_v12 }
 0x73f   :  { %2253 = vmatprep.subr.mxu1 %v2472_v12 }
 0x751   :  { %1363 = vrot.lane.b32.xlu0 %v2596_v40, %s2475_s5 }
 0x755   :  { %1598 = vrot.lane.b32.xlu0 %v2567_v16, %s2476_s25 }
 0x7c4   :  { %v1355_v58 = vpop.xlane.xlu0 %1354 }
 0x7c5   :  { %2304 = vrcp.f32 %v1355_v58 }
 0x7c8   :  { %v1364_v59 = vpop.permute.xlu0 %1363 }
 0x7c9   :  { %2229 = vmatpush3.msra.mxu0 %v1364_v59 }
 0x7ca   :  { %2238 = vmatprep.subr.mxu0 %v362_v1 }
 0x7cc   :  { %v1599_v60 = vpop.permute.xlu0 %1598 }
 0x7cd   :  { %2246 = vmatmul.mubr.msk.f32.vlgmr.msra.gmra.mxu1 %vm364_vm2, %v1599_v60 }
 0x7ce   :  { %2255 = vmatprep.mubr.msk.f32.mxu1 %vm2473_vm1, %v2472_v12 }
 0x7d2   :  { %v2305_v61 = vpop.eup %2304 }
 0x7d3   :  { %v1360_v62 = vmul.f32 %v2305_v61, %v2301_v53 }
 0x7d5   :  { %2231 = vmatmul.mubr.msk.f32.vlgmr.msra.gmra.mxu0 %vm364_vm2, %v1360_v62 }
 0x7d6   :  { %2239 = vmatpush3.msra.mxu0 %v362_v1 }
 0x7d7   :  { %2248 = vmatprep.subr.mxu0 %v2472_v12 }
 0x7fd   :  { %v1511_v63 = vpop.f32.mrf.mxu1 }
 0x7ff   :  { %v2237_v0 = vpop.f32.mrf.mxu1 }
 0x88d   :  { %v1672_v16 = vpop.f32.mrf.mxu1 }
 0x88e   :  { %v1754_v2 = vmul.f32 0.35355338, %v1672_v16 }
 0x88f   :  { %v2247_v3 = vpop.f32.mrf.mxu1 }
 0x890   :  { %v1756_v4 = vsel %vm364_vm2, %v1754_v2, -inf }
 0x891   :  { %1757 = vmax.xlane.f32.xlu0 %v1756_v4 }
 0x895   :  { %v1435_v6 = vpop.f32.mrf.mxu0 }
 0x896   :  { %2240 = vmatprep.mubr.msk.f32.mxu0 %vm364_vm2, %v1435_v6 }
 0x897   :  { %v2232_v7 = vpop.f32.mrf.mxu0  ;;  %2241 = vmatmul.mubr.msk.f32.vlgmr.msra.gmra.mxu0 %vm364_vm2, %v1511_v63 }
 0x898   :  { %2249 = vmatpush3.xpose.msk.msra.mxu0 %vm364_vm2, %v1679_v5  ;;  %2250 = vmatprep.mubr.msk.f32.mxu0 %vm2473_vm1, %v2472_v12 }
 0x899   :  { %2258 = vmatprep.subr.mxu0 %v2472_v12 }
 0x89b   :  { %2251 = vmatmul.mubr.msk.f32.vlgmr.msra.gmra.mxu0 %vm364_vm2, %v1677_v8 }
 0x89c   :  { %2260 = vmatprep.mubr.msk.f32.mxu0 %vm2473_vm1, %v2472_v12 }
 0x91a   :  { %v1758_v9 = vpop.xlane.xlu0 %1757 }
 0x91b   :  { %v1762_v10 = vsub.f32 %v1754_v2, %v1758_v9 }
 0x91d   :  { %v1764_v11 = vmul.f32 1.442695, %v1762_v10 }
 0x91f   :  { %2306 = vpow2.f32 %v1764_v11 }
 0x92c   :  { %v2307_v17 = vpop.eup %2306 }
 0x92d   :  { %v1768_v18 = vsel %vm364_vm2, %v2307_v17, 0.0 }
 0x92e   :  { %1769 = vadd.xlane.f32.xlu0 %v1768_v18 }
 0x957   :  { %v2242_v20 = vpop.f32.mrf.mxu0 }
 0x958   :  { %v1597_v22 = vadd.f32 %v2242_v20, %v1180_v19 }
 0x959   :  { %v1587_v23 = vpop.f32.mrf.mxu0 }
 0x95a   :  { %v1596_v24 = vadd.f32 %v1587_v23, %v1175_v21 }
 0x95b   :  { %v1750_v25 = vpop.f32.mrf.mxu0 }
 0x95c   :  { %v1755_v12 = vmul.f32 0.35355338, %v1750_v25 }
 0x95d   :  { %v2252_v26 = vpop.f32.mrf.mxu0 }
 0x95e   :  { %v1759_v27 = vsel %vm364_vm2, %v1755_v12, -inf }
 0x95f   :  { %1760 = vmax.xlane.f32.xlu1 %v1759_v27 }
 0x970   :  { %1854 = vrot.lane.b32.xlu1 %v2593_v39, %s2476_s25 }
 0x9b7   :  { %v1770_v34 = vpop.xlane.xlu0 %1769 }
 0x9e8   :  { %v1761_v28 = vpop.xlane.xlu1 %1760 }
 0x9e9   :  { %v1763_v29 = vsub.f32 %v1755_v12, %v1761_v28 }
 0x9eb   :  { %v1766_v30 = vmul.f32 1.442695, %v1763_v29 }
 0x9ec   :  { %v1855_v31 = vpop.permute.xlu1 %1854 }
 0x9ed   :  { %2308 = vpow2.f32 %v1766_v30  ;;  %2259 = vmatpush3.msra.mxu0 %v1855_v31 }
 0x9ee   :  { %2310 = vrcp.f32 %v1770_v34 }
 0x9fa   :  { %v2309_v32 = vpop.eup %2308 }
 0x9fb   :  { %v1771_v33 = vsel %vm364_vm2, %v2309_v32, 0.0  ;;  %v2311_v36 = vpop.eup %2310 }
 0x9fc   :  { %1772 = vadd.xlane.f32.xlu0 %v1771_v33  ;;  %v1775_v39 = vmul.f32 %v2311_v36, %v2307_v17 }
 0xa12   :  { %1778 = vrot.lane.b32.xlu0 %v2596_v40, %s2476_s25 }
 0xa85   :  { %v1773_v35 = vpop.xlane.xlu0 %1772 }
 0xa86   :  { %2312 = vrcp.f32 %v1773_v35 }
 0xa89   :  { %v1779_v37 = vpop.permute.xlu0 %1778 }
 0xa8a   :  { %2254 = vmatpush3.msra.mxu1 %v1779_v37 }
 0xa8b   :  { %2256 = vmatmul.mubr.msk.f32.vlgmr.msra.gmra.mxu1 %vm364_vm2, %v1775_v39  ;;  %2263 = vmatprep.subr.mxu1 %v363_v42 }
 0xa8c   :  { %2264 = vmatpush3.msra.mxu1 %v363_v42 }
 0xa93   :  { %v2313_v38 = vpop.eup %2312 }
 0xa94   :  { %v1777_v41 = vmul.f32 %v2313_v38, %v2309_v32 }
 0xa96   :  { %2261 = vmatmul.mubr.msk.f32.vlgmr.msra.gmra.mxu0 %vm364_vm2, %v1777_v41 }
 0xb4b   :  { %v1850_v43 = vpop.f32.mrf.mxu1 }
 0xb4c   :  { %2265 = vmatprep.mubr.msk.f32.mxu1 %vm364_vm2, %v1850_v43 }
 0xb4d   :  { %v2257_v40 = vpop.f32.mrf.mxu1 }
 0xb56   :  { %v1926_v44 = vpop.f32.mrf.mxu0 }
 0xb57   :  { %2266 = vmatmul.mubr.msk.f32.vlgmr.msra.gmra.mxu1 %vm364_vm2, %v1926_v44 }
 0xb58   :  { %v2262_v45 = vpop.f32.mrf.mxu0 }
 0xc17   :  { %v2267_v46 = vpop.f32.mrf.mxu1 }
 0xc18   :  { %v2012_v15 = vadd.f32 %v2267_v46, %v1597_v22 }
 0xc19   :  { %v2002_v47 = vpop.f32.mrf.mxu1 }
 0xc1a   :  { %2014 = vst [vmem:[#allocation13 + $0x8] sm:$0xff] %v2012_v15  ;;  %v2011_v13 = vadd.f32 %v2002_v47, %v1596_v24 }
 0xc1c   :  { %2013 = vst [vmem:[#allocation13] sm:$0xff] %v2011_v13 }
 0xc1d   :  { %2445 = shalt.err (!%p2442_p6)
}
 0xc1e   :  { %2026 = dma.vmem_to_hbm [thread:$0]  %s2021_s29, 256, %s2729_s6, [#allocation4], %s2466_s26, %s2466_s26, %s2467_s27  }
 0xc1f   :  { %2462 = dma.done.wait [#allocation4], 256  }
 0xc20   :  { %2463 = vsyncadd [#allocation4], 4294967040 }
 0xc21   :  { %2030 = vsyncpa [#allocation3], 1 }
 0xc22   :  { %2031 = vsyncpa [#allocation6], 1 }
 0xc23   :  { %2032 = vsyncpa [#allocation9], 1 }
 0xc24   :  { %2033 = vsyncpa [#allocation12], 1 }
 0xc25   :  { %2034 = vsyncpa [#allocation4], 1 }

</bundles_post_ra>
